<compile_context>
chip_gen: v6e
topology: v6e:2x2x1
jax: 0.10.0
libtpu: 0.0.40
codegen_flags: <defaults>
</compile_context>

<pallas_src>
import jax
import jax.numpy as jnp
from jax.experimental import pallas as pl
from jax.experimental.pallas import tpu as pltpu

LANE = 128  # hidden widths (64, 128, 96, 32) are zero-padded to this


def _round_up(n, m):
    return ((n + m - 1) // m) * m


def mlp_kernel(x_ref, w1_ref, w_ref, w5_ref, b_ref, b5_ref, o_ref):
    """Fused forward pass on one batch tile.

    x_ref : (bt, in_features)      f32  (cast to bf16 in-kernel)
    w1_ref: (in_features, 128)     bf16 (layer-1 weight, out-dim zero-padded)
    w_ref : (3, 128, 128)          bf16 (layers 2..4, zero-padded both dims)
    w5_ref: (128, pad_out)         bf16 (layer-5 weight, zero-padded)
    b_ref : (4, 128)               f32  (biases of layers 1..4, zero-padded)
    b5_ref: (1, pad_out)           f32  (layer-5 bias, zero-padded)
    o_ref : (bt, pad_out)          f32  (narrow padded output)
    """
    x = x_ref[...].astype(jnp.bfloat16)          # in-kernel cast (hidden under DMA)
    h = jnp.dot(x, w1_ref[...], preferred_element_type=jnp.float32)
    h = h + b_ref[0:1, :]
    for l in range(3):                           # layers 2..4
        h = jnp.maximum(h, 0.0)
        # dropout(p=0.25): identity in eval/inference mode
        # TODO(synk): train-mode dropout mask not implemented
        h = jnp.dot(h.astype(jnp.bfloat16), w_ref[l],
                    preferred_element_type=jnp.float32) + b_ref[l + 1:l + 2, :]
    h = jnp.maximum(h, 0.0)                      # ReLU after layer 4
    h = jnp.dot(h.astype(jnp.bfloat16), w5_ref[...],
                preferred_element_type=jnp.float32) + b5_ref[...]
    o_ref[...] = h.astype(o_ref.dtype)


def pack_params(params):
    """Zero-pad layers to 128 lanes (output layer to round_up(num_classes, 8))
    and pack into a few slabs. Zero padding keeps the math exact: padded lanes
    carry 0 through bias-add/ReLU and padded weight rows contribute 0 downstream.

    params: list of 5 (W (in, out) f32, b (out,) f32) tuples.
    Returns (w1_p, w_stack, w5_p, b_stack, b5_p, pad_out).
    """
    num_classes = params[-1][0].shape[1]
    pad_out = _round_up(num_classes, 8)
    for (w, _) in params[:-1]:
        assert w.shape[0] <= LANE and w.shape[1] <= LANE
    assert params[-1][0].shape[0] <= LANE and num_classes <= pad_out

    # Layer 1 weight: (in_features, 128)
    w1, b1 = params[0]
    w1_p = jnp.zeros((w1.shape[0], LANE), jnp.bfloat16)
    w1_p = w1_p.at[:, :w1.shape[1]].set(w1.astype(jnp.bfloat16))

    # Layers 2..4 weights: (3, 128, 128)
    w_stack = []
    for (w, _) in params[1:4]:
        wp = jnp.zeros((LANE, LANE), jnp.bfloat16)
        wp = wp.at[:w.shape[0], :w.shape[1]].set(w.astype(jnp.bfloat16))
        w_stack.append(wp)
    w_stack = jnp.stack(w_stack)

    # Layer 5 weight: (128, pad_out) — narrow output, cuts writeback bytes
    w5, b5 = params[4]
    w5_p = jnp.zeros((LANE, pad_out), jnp.bfloat16)
    w5_p = w5_p.at[:w5.shape[0], :w5.shape[1]].set(w5.astype(jnp.bfloat16))

    # Biases of layers 1..4: (4, 128)
    b_stack = []
    for (_, b) in params[:4]:
        bp = jnp.zeros((LANE,), jnp.float32)
        bp = bp.at[:b.shape[-1]].set(b.reshape(-1).astype(jnp.float32))
        b_stack.append(bp)
    b_stack = jnp.stack(b_stack)

    # Layer 5 bias: (1, pad_out)
    b5_p = jnp.zeros((1, pad_out), jnp.float32)
    b5_p = b5_p.at[0, :b5.shape[-1]].set(b5.reshape(-1).astype(jnp.float32))

    return w1_p, w_stack, w5_p, b_stack, b5_p, pad_out


def multiclass_forward(x, params, *, batch_tile=2048):
    """x: (B, input_size) float32. params: list of (W (in,out), b (out,))."""
    B, in_features = x.shape
    num_classes = params[-1][0].shape[1]

    # Batch tile: big (default 2048) to amortize per-step pipeline overhead,
    # but capped so the grid has >=2 steps (v7x: both TensorCores get work).
    half = _round_up((B + 1) // 2, 8)
    bt = max(8, min(batch_tile, half))

    w1_p, w_stack, w5_p, b_stack, b5_p, pad_out = pack_params(params)

    out_padded = pl.pallas_call(
        mlp_kernel,
        out_shape=jax.ShapeDtypeStruct((B, pad_out), jnp.float32),
        grid_spec=pltpu.PrefetchScalarGridSpec(
            num_scalar_prefetch=0,
            grid=(pl.cdiv(B, bt),),
            in_specs=[
                pl.BlockSpec((bt, in_features), lambda i: (i, 0)),
                pl.BlockSpec(w1_p.shape, lambda i: (0, 0)),
                pl.BlockSpec(w_stack.shape, lambda i: (0, 0, 0)),
                pl.BlockSpec(w5_p.shape, lambda i: (0, 0)),
                pl.BlockSpec(b_stack.shape, lambda i: (0, 0)),
                pl.BlockSpec(b5_p.shape, lambda i: (0, 0)),
            ],
            out_specs=pl.BlockSpec((bt, pad_out), lambda i: (i, 0)),
        ),
        compiler_params=pltpu.CompilerParams(
            dimension_semantics=("parallel",)),
    )(x, w1_p, w_stack, w5_p, b_stack, b5_p)

    # Strip the (tiny) lane padding of the class dim.
    return out_padded[:, :num_classes]


def init_params(key, input_size, num_classes):
    """PyTorch nn.Linear-style uniform init; W stored as (in, out)."""
    dims = [input_size, 64, 128, 96, 32, num_classes]
    params = []
    for i in range(len(dims) - 1):
        fan_in, fan_out = dims[i], dims[i + 1]
        key, kw, kb = jax.random.split(key, 3)
        bound = 1.0 / jnp.sqrt(fan_in)
        w = jax.random.uniform(kw, (fan_in, fan_out), jnp.float32, -bound, bound)
        b = jax.random.uniform(kb, (fan_out,), jnp.float32, -bound, bound)
        params.append((w, b))
    return params


def reference_forward(x, params):
    h = x
    for i, (w, b) in enumerate(params):
        h = h @ w + b
        if i < len(params) - 1:
            h = jnp.maximum(h, 0.0)
    return h


if __name__ == "__main__":
    key = jax.random.PRNGKey(0)
    key, kx, kp = jax.random.split(key, 3)

    batch = 50          # not a multiple of the tile: exercises edge-block padding
    input_size = 16
    num_classes = 5

    x = jax.random.normal(kx, (batch, input_size), jnp.float32)
    params = init_params(kp, input_size, num_classes)

    # Small batch => bt is capped at round_up(ceil(50/2), 8) = 32, so the grid
    # has 2 steps (multi-step pipeline + edge block exercised).
    out = multiclass_forward(x, params)
    out = jax.block_until_ready(out)

    ref = reference_forward(x, params)
    assert out.shape == (batch, num_classes)
    # bf16 matmul operands vs f32 reference -> loose tolerance.
    assert jnp.allclose(out, ref, atol=3e-2, rtol=3e-2), "mismatch vs JAX reference"

    print("KERNEL_OK")
</pallas_src>

<mosaic_0001>
module attributes {stable_mosaic.version = 11 : i64} {
  func.func @mlp_kernel(%arg0: i32, %arg1: memref<32x16xf32, #tpu.memory_space<vmem>>, %arg2: memref<16x128xbf16, #tpu.memory_space<vmem>>, %arg3: memref<3x128x128xbf16, #tpu.memory_space<vmem>>, %arg4: memref<128x8xbf16, #tpu.memory_space<vmem>>, %arg5: memref<4x128xf32, #tpu.memory_space<vmem>>, %arg6: memref<1x8xf32, #tpu.memory_space<vmem>>, %arg7: memref<32x8xf32, #tpu.memory_space<vmem>>) attributes {dimension_semantics = [#tpu.dimension_semantics<parallel>], iteration_bounds = array<i64: 2>, scalar_prefetch = 0 : i64, scratch_operands = 0 : i64, tpu.core_type = #tpu.core_type<tc>, window_params = [{transform_indices = @transform_0, window_bounds = array<i64: 32, 16>}, {pipeline_mode = #tpu.pipeline_mode<synchronous>, transform_indices = @transform_1, window_bounds = array<i64: 16, 128>}, {pipeline_mode = #tpu.pipeline_mode<synchronous>, transform_indices = @transform_2, window_bounds = array<i64: 3, 128, 128>}, {pipeline_mode = #tpu.pipeline_mode<synchronous>, transform_indices = @transform_3, window_bounds = array<i64: 128, 8>}, {pipeline_mode = #tpu.pipeline_mode<synchronous>, transform_indices = @transform_4, window_bounds = array<i64: 4, 128>}, {pipeline_mode = #tpu.pipeline_mode<synchronous>, transform_indices = @transform_5, window_bounds = array<i64: 1, 8>}, {transform_indices = @transform_6, window_bounds = array<i64: 32, 8>}]} {
    %c0 = arith.constant 0 : index
    %c0_0 = arith.constant 0 : index
    %0 = vector.load %arg1[%c0, %c0_0] : memref<32x16xf32, #tpu.memory_space<vmem>>, vector<32x16xf32>
    %1 = arith.truncf %0 : vector<32x16xf32> to vector<32x16xbf16>
    %c0_1 = arith.constant 0 : index
    %c0_2 = arith.constant 0 : index
    %2 = vector.load %arg2[%c0_1, %c0_2] : memref<16x128xbf16, #tpu.memory_space<vmem>>, vector<16x128xbf16>
    %cst = arith.constant dense<0.000000e+00> : vector<32x128xf32>
    %3 = tpu.matmul %1, %2, %cst {dimension_numbers = #tpu.dot_dimension_numbers<[1], [0], [0], [1], [0, 0, 1, 1], [], []>} : vector<32x16xbf16>, vector<16x128xbf16>, vector<32x128xf32> -> vector<32x128xf32>
    %c0_3 = arith.constant 0 : index
    %c0_4 = arith.constant 0 : index
    %4 = vector.load %arg5[%c0_3, %c0_4] : memref<4x128xf32, #tpu.memory_space<vmem>>, vector<1x128xf32>
    %5 = vector.broadcast %4 : vector<1x128xf32> to vector<32x128xf32>
    %6 = arith.addf %3, %5 : vector<32x128xf32>
    %cst_5 = arith.constant 0.000000e+00 : f32
    %7 = vector.broadcast %cst_5 : f32 to vector<32x128xf32>
    %8 = arith.maximumf %6, %7 : vector<32x128xf32>
    %9 = arith.truncf %8 : vector<32x128xf32> to vector<32x128xbf16>
    %c0_6 = arith.constant 0 : index
    %c0_7 = arith.constant 0 : index
    %c0_8 = arith.constant 0 : index
    %10 = vector.load %arg3[%c0_6, %c0_7, %c0_8] : memref<3x128x128xbf16, #tpu.memory_space<vmem>>, vector<1x128x128xbf16>
    %11 = vector.shape_cast %10 : vector<1x128x128xbf16> to vector<128x128xbf16>
    %cst_9 = arith.constant dense<0.000000e+00> : vector<32x128xf32>
    %12 = tpu.matmul %9, %11, %cst_9 {dimension_numbers = #tpu.dot_dimension_numbers<[1], [0], [0], [1], [0, 0, 1, 1], [], []>} : vector<32x128xbf16>, vector<128x128xbf16>, vector<32x128xf32> -> vector<32x128xf32>
    %c1 = arith.constant 1 : index
    %c0_10 = arith.constant 0 : index
    %13 = vector.load %arg5[%c1, %c0_10] : memref<4x128xf32, #tpu.memory_space<vmem>>, vector<1x128xf32>
    %14 = vector.broadcast %13 : vector<1x128xf32> to vector<32x128xf32>
    %15 = arith.addf %12, %14 : vector<32x128xf32>
    %cst_11 = arith.constant 0.000000e+00 : f32
    %16 = vector.broadcast %cst_11 : f32 to vector<32x128xf32>
    %17 = arith.maximumf %15, %16 : vector<32x128xf32>
    %18 = arith.truncf %17 : vector<32x128xf32> to vector<32x128xbf16>
    %c1_12 = arith.constant 1 : index
    %c0_13 = arith.constant 0 : index
    %c0_14 = arith.constant 0 : index
    %19 = vector.load %arg3[%c1_12, %c0_13, %c0_14] : memref<3x128x128xbf16, #tpu.memory_space<vmem>>, vector<1x128x128xbf16>
    %20 = vector.shape_cast %19 : vector<1x128x128xbf16> to vector<128x128xbf16>
    %cst_15 = arith.constant dense<0.000000e+00> : vector<32x128xf32>
    %21 = tpu.matmul %18, %20, %cst_15 {dimension_numbers = #tpu.dot_dimension_numbers<[1], [0], [0], [1], [0, 0, 1, 1], [], []>} : vector<32x128xbf16>, vector<128x128xbf16>, vector<32x128xf32> -> vector<32x128xf32>
    %c2 = arith.constant 2 : index
    %c0_16 = arith.constant 0 : index
    %22 = vector.load %arg5[%c2, %c0_16] : memref<4x128xf32, #tpu.memory_space<vmem>>, vector<1x128xf32>
    %23 = vector.broadcast %22 : vector<1x128xf32> to vector<32x128xf32>
    %24 = arith.addf %21, %23 : vector<32x128xf32>
    %cst_17 = arith.constant 0.000000e+00 : f32
    %25 = vector.broadcast %cst_17 : f32 to vector<32x128xf32>
    %26 = arith.maximumf %24, %25 : vector<32x128xf32>
    %27 = arith.truncf %26 : vector<32x128xf32> to vector<32x128xbf16>
    %c2_18 = arith.constant 2 : index
    %c0_19 = arith.constant 0 : index
    %c0_20 = arith.constant 0 : index
    %28 = vector.load %arg3[%c2_18, %c0_19, %c0_20] : memref<3x128x128xbf16, #tpu.memory_space<vmem>>, vector<1x128x128xbf16>
    %29 = vector.shape_cast %28 : vector<1x128x128xbf16> to vector<128x128xbf16>
    %cst_21 = arith.constant dense<0.000000e+00> : vector<32x128xf32>
    %30 = tpu.matmul %27, %29, %cst_21 {dimension_numbers = #tpu.dot_dimension_numbers<[1], [0], [0], [1], [0, 0, 1, 1], [], []>} : vector<32x128xbf16>, vector<128x128xbf16>, vector<32x128xf32> -> vector<32x128xf32>
    %c3 = arith.constant 3 : index
    %c0_22 = arith.constant 0 : index
    %31 = vector.load %arg5[%c3, %c0_22] : memref<4x128xf32, #tpu.memory_space<vmem>>, vector<1x128xf32>
    %32 = vector.broadcast %31 : vector<1x128xf32> to vector<32x128xf32>
    %33 = arith.addf %30, %32 : vector<32x128xf32>
    %cst_23 = arith.constant 0.000000e+00 : f32
    %34 = vector.broadcast %cst_23 : f32 to vector<32x128xf32>
    %35 = arith.maximumf %33, %34 : vector<32x128xf32>
    %36 = arith.truncf %35 : vector<32x128xf32> to vector<32x128xbf16>
    %c0_24 = arith.constant 0 : index
    %c0_25 = arith.constant 0 : index
    %37 = vector.load %arg4[%c0_24, %c0_25] : memref<128x8xbf16, #tpu.memory_space<vmem>>, vector<128x8xbf16>
    %cst_26 = arith.constant dense<0.000000e+00> : vector<32x8xf32>
    %38 = tpu.matmul %36, %37, %cst_26 {dimension_numbers = #tpu.dot_dimension_numbers<[1], [0], [0], [1], [0, 0, 1, 1], [], []>} : vector<32x128xbf16>, vector<128x8xbf16>, vector<32x8xf32> -> vector<32x8xf32>
    %c0_27 = arith.constant 0 : index
    %c0_28 = arith.constant 0 : index
    %39 = vector.load %arg6[%c0_27, %c0_28] : memref<1x8xf32, #tpu.memory_space<vmem>>, vector<1x8xf32>
    %40 = vector.broadcast %39 : vector<1x8xf32> to vector<32x8xf32>
    %41 = arith.addf %38, %40 : vector<32x8xf32>
    %c0_29 = arith.constant 0 : index
    %c0_30 = arith.constant 0 : index
    %42 = vector.load %arg7[%c0_29, %c0_30] : memref<32x8xf32, #tpu.memory_space<vmem>>, vector<32x8xf32>
    tpu.vector_store %arg7[%c0_29, %c0_30], %41 {strides = array<i32>} : memref<32x8xf32, #tpu.memory_space<vmem>>, vector<32x8xf32>,
    return
  }
  func.func @transform_0(%arg0: i32) -> (i32, i32) {
    %c0_i32 = arith.constant 0 : i32
    %c0_i32_0 = arith.constant 0 : i32
    return %arg0, %c0_i32 : i32, i32
  }
  func.func @transform_1(%arg0: i32) -> (i32, i32) {
    %c0_i32 = arith.constant 0 : i32
    %c0_i32_0 = arith.constant 0 : i32
    %c0_i32_1 = arith.constant 0 : i32
    return %c0_i32, %c0_i32_0 : i32, i32
  }
  func.func @transform_2(%arg0: i32) -> (i32, i32, i32) {
    %c0_i32 = arith.constant 0 : i32
    %c0_i32_0 = arith.constant 0 : i32
    %c0_i32_1 = arith.constant 0 : i32
    %c0_i32_2 = arith.constant 0 : i32
    return %c0_i32, %c0_i32_0, %c0_i32_1 : i32, i32, i32
  }
  func.func @transform_3(%arg0: i32) -> (i32, i32) {
    %c0_i32 = arith.constant 0 : i32
    %c0_i32_0 = arith.constant 0 : i32
    %c0_i32_1 = arith.constant 0 : i32
    return %c0_i32, %c0_i32_0 : i32, i32
  }
  func.func @transform_4(%arg0: i32) -> (i32, i32) {
    %c0_i32 = arith.constant 0 : i32
    %c0_i32_0 = arith.constant 0 : i32
    %c0_i32_1 = arith.constant 0 : i32
    return %c0_i32, %c0_i32_0 : i32, i32
  }
  func.func @transform_5(%arg0: i32) -> (i32, i32) {
    %c0_i32 = arith.constant 0 : i32
    %c0_i32_0 = arith.constant 0 : i32
    %c0_i32_1 = arith.constant 0 : i32
    return %c0_i32, %c0_i32_0 : i32, i32
  }
  func.func @transform_6(%arg0: i32) -> (i32, i32) {
    %c0_i32 = arith.constant 0 : i32
    %c0_i32_0 = arith.constant 0 : i32
    return %arg0, %c0_i32 : i32, i32
  }
}

</mosaic_0001>

<bundles_post_ra>
// kernel: tpu_custom_call.1
= control target key start
LH: loop header
LB: loop body
LE: loop exit
PB: predicated region body
PF: predicated region fallthrough
CT: control target
= control target key end

     0   :  { %11 = vsyncpa [#allocation3], 0  ;;  %s1597_s21 = smov 0   ;;  %s1599_s22 = smov 0   ;;  %s1757_s0 = inlined_call_operand.vmem [shape: f32[50,16], index: 0, kind: input, shape index: {}]   ;;  %s1758_s1 = inlined_call_operand.vmem [shape: bf16[16,128], index: 1, kind: input, shape index: {}]   ;;  %s1759_s2 = inlined_call_operand.hbm [shape: bf16[3,128,128], index: 2, kind: input, shape index: {}]   ;;  %s1760_s3 = inlined_call_operand.vmem [shape: bf16[128,8], index: 3, kind: input, shape index: {}]   ;;  %s1761_s4 = inlined_call_operand.vmem [shape: f32[4,128], index: 4, kind: input, shape index: {}]   ;;  %s1762_s5 = inlined_call_operand.vmem [shape: f32[1,8], index: 5, kind: input, shape index: {}]   ;;  %s1763_s6 = inlined_call_operand.vmem [shape: f32[50,8], index: 6, kind: output, shape index: {}]  }
   0x1   :  { %s1601_s23 = smov 0  }
   0x2 LB: > { %s1610_s24 = sadd.s32 4294967295, %s1525_s23   ;;  %s1612_s25 = sadd.s32 1, %s1525_s23   ;;  %s1525_s23 = sphi %s1601_s23, %s1771_s23   ;;  %s1521_s22 = sphi %s1599_s22, %s1770_s22   ;;  %s1517_s21 = sphi %s1597_s21, %s1769_s21  }
   0x3   : > { %s152_s26 = ssub.s32 %s1525_s23, %s1612_s25  ;;  %s155_s27 = sadd.s32 1, %s1521_s22 }
   0x4   : > { %p153_p0 = scmp.eq.s32.totalorder %s152_s26, 0  ;;  %p165_p1 = scmp.ne.s32.totalorder %s1521_s22, %s1517_s21 }
   0x5   : > { %p166_p2 = scmp.eq.s32.totalorder %s1610_s24, 1  ;;  %p1110_p3 = scmp.ge.s32.totalorder %s1525_s23, 1 }
   0x6   : > { %s1620_s28 = scalar_select %p153_p0, %s1521_s22, %s155_s27  }
   0x7   : > { %p1622_p4 = por %p166_p2, %p165_p1  ;;  %p179_p5 = scmp.lt.s32.totalorder %s1525_s23, 3 }
   0x8   : > { %p1315_p6 = scmp.eq.s32.totalorder %s1610_s24, 0  ;;  %s1559_s7 = smov [#allocation2]  }
   0x9   : > { %p1627_p7 = pnand %p1110_p3, %p179_p5  ;;  %s194_s8 = sshll.u32 %s1559_s7, 4  ;;  %s195_s8 = int_to_ptr.vmem [resolvable:$true] %s194_s8 }
   0xa   : > { %s1452_s9 = scalar_lea.vmem %s195_s8, 3072  ;;  %p1460_p0 = scmp.lt.s32.totalorder %s195_s8, %s195_s8 }
   0xb   : > { %p1311_p8 = pneg %p1627_p7  ;;  %p1453_p11 = scmp.ne.s32.totalorder %s195_s8, %s1452_s9 }
   0xc   : > { %p1461_p1 = scmp.lt.s32.totalorder %s1452_s9, %s1452_s9 }
   0xd   : > { %p1312_p9 = pnand %p1315_p6, %p1311_p8 }
   0xe   : > { %p1462_p2 = por %p1461_p1, %p1460_p0 }
   0xf   : > { %p1443_p10 = pneg %p1312_p9 }
  0x11   : > { %p1455_p12 = pnand %p1453_p11, %p1443_p10 }
  0x13   : > { %p1456_p13 = pneg %p1455_p12 }
  0x15   : > { %p1463_p3 = pnand %p1462_p2, %p1456_p13 }
  0x17   : > { %1466 = shalt.err (!%p1463_p3)
}
  0x18   : > { %s1560_s10 = smov 64   ;;  %s1561_s11 = smov 4  }
  0x19   : > { %1314 = dma.hbm_to_vmem [thread:$0]  (!%p1312_p9), %s1759_s2, 3072, %s195_s8, [#allocation3], %s1560_s10, %s1560_s10, %s1561_s11  }
  0x1a   : > { %236 = sbr.rel (%p1627_p7) target bundleno = 1108 (0x454), region = 44 }
  0x1f   : > { %1512 = dma.done.wait (%p1315_p6), [#allocation3], 3072  }
  0x20   : > { %1514 = vsyncadd (%p1315_p6), [#allocation3], 4294964224  ;;  %s1645_s14 = sshll.u32 %s1610_s24, 2  ;;  %v1408_v0 = vld [vmem:[%s1758_s1] sm:$0xff]   ;;  %vm308_vm0 = vcmask 130048   ;;  %v1409_v7 = vld [vmem:[#allocation2 + $0x38] sm:$0xff]  }
  0x21   : > { %p274_p5 = scmp.lt.s32.totalorder %s1645_s14, 6  ;;  %1221 = vmatprep.subr.bf16.mxu0 %v1408_v0  ;;  %v1410_v8 = vld [vmem:[#allocation2 + $0x30] sm:$0xff]   ;;  %1227 = vmatprep.subr.bf16.mxu1 %v1409_v7  ;;  %v1411_v9 = vld [vmem:[#allocation2 + $0x28] sm:$0xff]   ;;  %v1412_v10 = vld [vmem:[#allocation2 + $0x20] sm:$0xff]   ;;  %s266_s11 = sand.u32 1, %s1517_s21   ;;  %vm864_vm1 = vcmask 64512  }
  0x22   : > { %1222 = vmatpush3.bf16.msra.mxu0 %v1408_v0  ;;  %1228 = vmatpush3.bf16.msra.mxu1 %v1409_v7  ;;  %v1413_v11 = vld [vmem:[#allocation2 + $0x18] sm:$0xff]   ;;  %v1414_v12 = vld [vmem:[#allocation2 + $0x10] sm:$0xff]   ;;  %v1415_v13 = vld [vmem:[#allocation2 + $0x8] sm:$0xff]   ;;  %s1115_s12 = sshll.u32 %s266_s11, 5  ;;  %s877_s21 = ssub.s32 (%p1622_p4), 7, %s1645_s14 }
  0x23   : > { %s275_s15 = scalar_select %p274_p5, %s1645_s14, 6  ;;  %1229 = vmatprep.subr.bf16.mxu1 %v1410_v8  ;;  %v1416_v14 = vld [vmem:[#allocation2] sm:$0xff]   ;;  %v1417_v15 = vld [vmem:[#allocation2 + $0x78] sm:$0xff]   ;;  %v1418_v16 = vld [vmem:[#allocation2 + $0x70] sm:$0xff]  }
  0x24   : > { %1247 = vmatprep.subr.bf16.mxu0 %v1417_v15  ;;  %v1419_v17 = vld [vmem:[#allocation2 + $0x68] sm:$0xff]   ;;  %v1420_v18 = vld [vmem:[#allocation2 + $0x60] sm:$0xff]   ;;  %v1421_v19 = vld [vmem:[#allocation2 + $0x58] sm:$0xff]   ;;  %s1175_s17 = sshll.u32 (%p1622_p4), %s1610_s24, 5  ;;  %p878_p6 = scmp.lt.s32.totalorder (%p1622_p4), %s877_s21, 4 }
  0x25   : > { %s1117_s16 = sshll.u32 %s275_s15, 3  ;;  %v1118_v22 = vld [vmem:[%s1761_s4] ss:$0 sm:$0xff]  ;;  %v1422_v35 = vld [vmem:[#allocation2 + $0x50] sm:$0xff]   ;;  %v1423_v36 = vld [vmem:[#allocation2 + $0x48] sm:$0xff]   ;;  %s1708_s20 = scalar_lea.vmem (%p1622_p4), %s1763_s6, %s1175_s17  }
  0x26   : > { %s277_s19 = scalar_lea.vmem %s1757_s0, %s1117_s16  ;;  %1230 = vmatpush3.bf16.msra.mxu1 %v1410_v8  ;;  %v1424_v37 = vld [vmem:[#allocation2 + $0x40] sm:$0xff]   ;;  %v1425_v38 = vld [vmem:[#allocation2 + $0xb8] sm:$0xff]   ;;  %v1426_v39 = vld [vmem:[#allocation2 + $0xb0] sm:$0xff]   ;;  %s1695_s16 = scalar_lea.vmem [#allocation4], %s1115_s12  }
  0x27   : > { %v289_v1 = vld [vmem:[%s277_s19] sm:$0xff]  ;;  %v290_v2 = vld [vmem:[%s277_s19 + $0x8] sm:$0xff]  ;;  %v291_v3 = vld [vmem:[%s277_s19 + $0x10] sm:$0xff]  ;;  %1231 = vmatprep.subr.bf16.mxu1 %v1411_v9 }
  0x28   : > { %v293_v4 = vpack.c.bf16 %v290_v2, %v289_v1  ;;  %v292_v5 = vld [vmem:[%s277_s19 + $0x18] sm:$0xff]  ;;  %v1427_v40 = vld [vmem:[#allocation2 + $0xa8] sm:$0xff]   ;;  %v1428_v41 = vld [vmem:[#allocation2 + $0xa0] sm:$0xff]  }
  0x29   : > { %v294_v6 = vpack.c.bf16 %v292_v5, %v291_v3  ;;  %v1429_v42 = vld [vmem:[#allocation2 + $0x98] sm:$0xff]   ;;  %v1122_v45 = vld [vmem:[%s1761_s4 + $0x1] ss:$0 sm:$0xff]  ;;  %v1430_v58 = vld [vmem:[#allocation2 + $0x90] sm:$0xff]  }
  0x2a   : > { %1223 = vmatprep.mubr.msk.bf16.mxu0 %vm308_vm0, %v293_v4  ;;  %1232 = vmatpush3.bf16.msra.mxu1 %v1411_v9  ;;  %v1431_v59 = vld [vmem:[#allocation2 + $0x88] sm:$0xff]   ;;  %v1432_v60 = vld [vmem:[#allocation2 + $0x80] sm:$0xff]   ;;  %v1433_v61 = vld [vmem:[%s1760_s3 + $0x38] sm:$0xff]  }
  0x2b   : > { %1224 = vmatmul.mubr.msk.bf16.vlgmr.msra.gmra.mxu0 %vm308_vm0, %v294_v6  ;;  %1233 = vmatprep.subr.bf16.mxu1 %v1412_v10  ;;  %v1434_v62 = vld [vmem:[%s1760_s3 + $0x30] sm:$0xff]   ;;  %v1435_v63 = vld [vmem:[%s1760_s3 + $0x28] sm:$0xff]   ;;  %v1436_v0 = vld [vmem:[%s1760_s3 + $0x20] sm:$0xff]  }
  0x2c   : > { %1248 = vmatpush3.bf16.msra.mxu0 %v1417_v15  ;;  %v1437_v1 = vld [vmem:[%s1760_s3 + $0x18] sm:$0xff]   ;;  %v1131_v4 = vld [vmem:[%s1761_s4 + $0x2] ss:$0 sm:$0xff] }
  0x2d   : > { %1249 = vmatprep.subr.bf16.mxu0 %v1418_v16 }
  0x2e   : > { %1234 = vmatpush3.bf16.msra.mxu1 %v1412_v10 }
  0x2f   : > { %1235 = vmatprep.subr.bf16.mxu1 %v1413_v11 }
  0x30   : > { %1250 = vmatpush3.bf16.msra.mxu0 %v1418_v16 }
  0x31   : > { %1251 = vmatprep.subr.bf16.mxu0 %v1419_v17 }
  0x32   : > { %1236 = vmatpush3.bf16.msra.mxu1 %v1413_v11 }
  0x33   : > { %1237 = vmatprep.subr.bf16.mxu1 %v1414_v12 }
  0x34   : > { %1252 = vmatpush3.bf16.msra.mxu0 %v1419_v17  ;;  %v1438_v17 = vld [vmem:[%s1760_s3 + $0x10] sm:$0xff]  }
  0x35   : > { %1253 = vmatprep.subr.bf16.mxu0 %v1420_v18 }
  0x36   : > { %1238 = vmatpush3.bf16.msra.mxu1 %v1414_v12 }
  0x37   : > { %1239 = vmatprep.subr.bf16.mxu1 %v1415_v13 }
  0x38   : > { %1254 = vmatpush3.bf16.msra.mxu0 %v1420_v18  ;;  %v1439_v18 = vld [vmem:[%s1760_s3 + $0x8] sm:$0xff]  }
  0x39   : > { %1255 = vmatprep.subr.bf16.mxu0 %v1421_v19 }
  0x3a   : > { %1240 = vmatpush3.bf16.msra.mxu1 %v1415_v13 }
  0x3b   : > { %1241 = vmatprep.subr.bf16.mxu1 %v1416_v14 }
  0x3c   : > { %1256 = vmatpush3.bf16.msra.mxu0 %v1421_v19  ;;  %v1440_v19 = vld [vmem:[%s1760_s3] sm:$0xff]  }
  0x3d   : > { %1257 = vmatprep.subr.bf16.mxu0 %v1422_v35 }
  0x3e   : > { %1242 = vmatpush3.bf16.msra.mxu1 %v1416_v14 }
  0x3f   : > { %1267 = vmatprep.subr.bf16.mxu1 %v1425_v38 }
  0x40   : > { %1258 = vmatpush3.bf16.msra.mxu0 %v1422_v35  ;;  %v1149_v35 = vld [vmem:[%s1762_s5] ss:$0 sm:$0xff] }
  0x41   : > { %1259 = vmatprep.subr.bf16.mxu0 %v1423_v36 }
  0x44   : > { %1260 = vmatpush3.bf16.msra.mxu0 %v1423_v36 }
  0x45   : > { %1261 = vmatprep.subr.bf16.mxu0 %v1424_v37 }
  0x48   : > { %1262 = vmatpush3.bf16.msra.mxu0 %v1424_v37 }
  0x49   : > { %1287 = vmatprep.subr.bf16.mxu0 %v1433_v61 }
  0xeb   : > { %v1225_v20 = vpop.f32.mrf.mxu0 }
  0xec   : > { %v358_v26 = vadd.f32 %v1225_v20, %v1118_v22 }
  0xed   : > { %v349_v21 = vpop.f32.mrf.mxu0 }
  0xee   : > { %v350_v24 = vadd.f32 %v1118_v22, %v349_v21  ;;  %v366_v32 = vmax.f32 %v358_v26, 0.0 }
  0xef   : > { %v1226_v23 = vpop.f32.mrf.mxu0 }
  0xf0   : > { %v361_v25 = vadd.f32 %v1226_v23, %v1118_v22  ;;  %v364_v30 = vmax.f32 %v350_v24, 0.0 }
  0xf1   : > { %v352_v27 = vpop.f32.mrf.mxu0 }
  0xf2   : > { %v353_v28 = vadd.f32 %v1118_v22, %v352_v27  ;;  %v367_v29 = vmax.f32 %v361_v25, 0.0  ;;  %v1140_v22 = vld [vmem:[%s1761_s4 + $0x3] ss:$0 sm:$0xff] }
  0xf4   : > { %v365_v31 = vmax.f32 %v353_v28, 0.0  ;;  %v369_v34 = vpack.c.bf16 %v367_v29, %v366_v32 }
  0xf6   : > { %v368_v33 = vpack.c.bf16 %v365_v31, %v364_v30 }
  0xf8   : > { %1243 = vmatprep.mubr.bf16.mxu1 %v368_v33 }
  0xf9   : > { %1244 = vmatmul.mubr.bf16.vlgmr.msra.gmra.mxu1 %v369_v34 }
  0xfa   : > { %1268 = vmatpush3.bf16.msra.mxu1 %v1425_v38 }
  0xfb   : > { %1269 = vmatprep.subr.bf16.mxu1 %v1426_v39 }
  0xfe   : > { %1270 = vmatpush3.bf16.msra.mxu1 %v1426_v39 }
  0xff   : > { %1271 = vmatprep.subr.bf16.mxu1 %v1427_v40 }
 0x102   : > { %1272 = vmatpush3.bf16.msra.mxu1 %v1427_v40 }
 0x103   : > { %1273 = vmatprep.subr.bf16.mxu1 %v1428_v41 }
 0x106   : > { %1274 = vmatpush3.bf16.msra.mxu1 %v1428_v41 }
 0x107   : > { %1275 = vmatprep.subr.bf16.mxu1 %v1429_v42 }
 0x10a   : > { %1276 = vmatpush3.bf16.msra.mxu1 %v1429_v42 }
 0x10b   : > { %1277 = vmatprep.subr.bf16.mxu1 %v1430_v58 }
 0x10e   : > { %1278 = vmatpush3.bf16.msra.mxu1 %v1430_v58 }
 0x10f   : > { %1279 = vmatprep.subr.bf16.mxu1 %v1431_v59 }
 0x112   : > { %1280 = vmatpush3.bf16.msra.mxu1 %v1431_v59 }
 0x113   : > { %1281 = vmatprep.subr.bf16.mxu1 %v1432_v60 }
 0x116   : > { %1282 = vmatpush3.bf16.msra.mxu1 %v1432_v60 }
 0x1b9   : > { %v1245_v43 = vpop.f32.mrf.mxu1 }
 0x1ba   : > { %v482_v49 = vadd.f32 %v1245_v43, %v1122_v45 }
 0x1bb   : > { %v473_v44 = vpop.f32.mrf.mxu1 }
 0x1bc   : > { %v474_v47 = vadd.f32 %v1122_v45, %v473_v44  ;;  %v490_v55 = vmax.f32 %v482_v49, 0.0 }
 0x1bd   : > { %v1246_v46 = vpop.f32.mrf.mxu1 }
 0x1be   : > { %v485_v48 = vadd.f32 %v1246_v46, %v1122_v45  ;;  %v488_v53 = vmax.f32 %v474_v47, 0.0 }
 0x1bf   : > { %v476_v50 = vpop.f32.mrf.mxu1 }
 0x1c0   : > { %v477_v51 = vadd.f32 %v1122_v45, %v476_v50  ;;  %v491_v52 = vmax.f32 %v485_v48, 0.0 }
 0x1c2   : > { %v489_v54 = vmax.f32 %v477_v51, 0.0  ;;  %v493_v57 = vpack.c.bf16 %v491_v52, %v490_v55 }
 0x1c4   : > { %v492_v56 = vpack.c.bf16 %v489_v54, %v488_v53 }
 0x1c6   : > { %1263 = vmatprep.mubr.bf16.mxu0 %v492_v56 }
 0x1c7   : > { %1264 = vmatmul.mubr.bf16.vlgmr.msra.gmra.mxu0 %v493_v57 }
 0x1c8   : > { %1288 = vmatpush3.bf16.msra.mxu0 %v1433_v61 }
 0x1c9   : > { %1289 = vmatprep.subr.bf16.mxu0 %v1434_v62 }
 0x1cc   : > { %1290 = vmatpush3.bf16.msra.mxu0 %v1434_v62 }
 0x1cd   : > { %1291 = vmatprep.subr.bf16.mxu0 %v1435_v63 }
 0x1d0   : > { %1292 = vmatpush3.bf16.msra.mxu0 %v1435_v63 }
 0x1d1   : > { %1293 = vmatprep.subr.bf16.mxu0 %v1436_v0 }
 0x1d4   : > { %1294 = vmatpush3.bf16.msra.mxu0 %v1436_v0 }
 0x1d5   : > { %1295 = vmatprep.subr.bf16.mxu0 %v1437_v1 }
 0x1d8   : > { %1296 = vmatpush3.bf16.msra.mxu0 %v1437_v1 }
 0x1d9   : > { %1297 = vmatprep.subr.bf16.mxu0 %v1438_v17 }
 0x1dc   : > { %1298 = vmatpush3.bf16.msra.mxu0 %v1438_v17 }
 0x1dd   : > { %1299 = vmatprep.subr.bf16.mxu0 %v1439_v18 }
 0x1e0   : > { %1300 = vmatpush3.bf16.msra.mxu0 %v1439_v18 }
 0x1e1   : > { %1301 = vmatprep.subr.bf16.mxu0 %v1440_v19 }
 0x1e4   : > { %1302 = vmatpush3.bf16.msra.mxu0 %v1440_v19 }
 0x287   : > { %v1265_v2 = vpop.f32.mrf.mxu0 }
 0x288   : > { %v607_v8 = vadd.f32 %v1265_v2, %v1131_v4 }
 0x289   : > { %v598_v3 = vpop.f32.mrf.mxu0 }
 0x28a   : > { %v599_v6 = vadd.f32 %v1131_v4, %v598_v3  ;;  %v615_v14 = vmax.f32 %v607_v8, 0.0 }
 0x28b   : > { %v1266_v5 = vpop.f32.mrf.mxu0 }
 0x28c   : > { %v610_v7 = vadd.f32 %v1266_v5, %v1131_v4  ;;  %v613_v12 = vmax.f32 %v599_v6, 0.0 }
 0x28d   : > { %v601_v9 = vpop.f32.mrf.mxu0 }
 0x28e   : > { %v602_v10 = vadd.f32 %v1131_v4, %v601_v9  ;;  %v616_v11 = vmax.f32 %v610_v7, 0.0 }
 0x290   : > { %v614_v13 = vmax.f32 %v602_v10, 0.0  ;;  %v618_v16 = vpack.c.bf16 %v616_v11, %v615_v14 }
 0x292   : > { %v617_v15 = vpack.c.bf16 %v614_v13, %v613_v12 }
 0x294   : > { %1283 = vmatprep.mubr.bf16.mxu1 %v617_v15 }
 0x295   : > { %1284 = vmatmul.mubr.bf16.vlgmr.msra.gmra.mxu1 %v618_v16 }
 0x355   : > { %v1285_v20 = vpop.f32.mrf.mxu1 }
 0x356   : > { %v732_v26 = vadd.f32 %v1285_v20, %v1140_v22 }
 0x357   : > { %v723_v21 = vpop.f32.mrf.mxu1 }
 0x358   : > { %v724_v24 = vadd.f32 %v1140_v22, %v723_v21  ;;  %v740_v32 = vmax.f32 %v732_v26, 0.0 }
 0x359   : > { %v1286_v23 = vpop.f32.mrf.mxu1 }
 0x35a   : > { %v735_v25 = vadd.f32 %v1286_v23, %v1140_v22  ;;  %v738_v30 = vmax.f32 %v724_v24, 0.0 }
 0x35b   : > { %v726_v27 = vpop.f32.mrf.mxu1 }
 0x35c   : > { %v727_v28 = vadd.f32 %v1140_v22, %v726_v27  ;;  %v741_v29 = vmax.f32 %v735_v25, 0.0 }
 0x35e   : > { %v739_v31 = vmax.f32 %v727_v28, 0.0  ;;  %v743_v34 = vpack.c.bf16 %v741_v29, %v740_v32 }
 0x360   : > { %v742_v33 = vpack.c.bf16 %v739_v31, %v738_v30 }
 0x362   : > { %1303 = vmatprep.mubr.bf16.mxu0 %v742_v33 }
 0x363   : > { %1304 = vmatmul.mubr.bf16.vlgmr.msra.gmra.mxu0 %v743_v34 }
 0x423   : > { %v1305_v36 = vpop.f32.mrf.mxu0 }
 0x424   : > { %v858_v37 = vadd.f32 %v1305_v36, %v1149_v35 }
 0x425   : > { %v849_v38 = vpop.f32.mrf.mxu0 }
 0x426   : > { %867 = vst.msk [vmem:[%s1695_s16 + $0x10] sm:$0xff] %vm864_vm1, %v858_v37  ;;  %v850_v39 = vadd.f32 %v1149_v35, %v849_v38 }
 0x427   : > { %v1306_v40 = vpop.f32.mrf.mxu0 }
 0x428   : > { %865 = vst.msk [vmem:[%s1695_s16] sm:$0xff] %vm864_vm1, %v850_v39  ;;  %v861_v41 = vadd.f32 %v1306_v40, %v1149_v35  ;;  %875 = sbr.rel (!%p1622_p4) target bundleno = 1108 (0x454), region = 52 }
 0x429   : > { %v852_v42 = vpop.f32.mrf.mxu0 }
 0x42a   : > { %868 = vst.msk [vmem:[%s1695_s16 + $0x18] sm:$0xff] %vm864_vm1, %v861_v41  ;;  %v853_v43 = vadd.f32 %v1149_v35, %v852_v42 }
 0x42c   : > { %866 = vst.msk [vmem:[%s1695_s16 + $0x8] sm:$0xff] %vm864_vm1, %v853_v43 }
 0x42d   : > { %s1773_s21 = smov (!%p878_p6, %s877_s21), 4 }
 0x42e   : > { %s1160_s23 = sshll.u32 %s1773_s21, 7 }
 0x42f   : > { %p1163_p7 = scmp.eq.s32.totalorder %s1160_s23, 0 }
 0x430   : > { %s1714_s26 = sshrl.u32 (!%p1163_p7), %s1773_s21, 2 }
 0x431   : > { %886 = sbr.rel (%p1163_p7) target bundleno = 1108 (0x454), region = 56  ;;  %p1164_p4 = scmp.le.s32.totalorder (!%p1163_p7), %s1714_s26, 0 }
 0x436   : > { %1056 = sbr.rel (%p1164_p4) target bundleno = 1091 (0x443), region = 135  ;;  %s1766_s24 = smov (!%p1164_p4), %s1708_s20 }
 0x437   : > { %s1767_s29 = smov (!%p1164_p4), %s1695_s16  ;;  %s1723_s14 = smov (!%p1164_p4), 0  }
 0x438   : > { %s1539_s27 = smov (!%p1164_p4), 0  }
 0x43b LB: >> { %v955_v44 = vld [vmem:[%s1533_s29] sm:$0xff]  ;;  %v957_v45 = vld [vmem:[%s1533_s29 + $0x8] sm:$0xff]  ;;  %v959_v46 = vld [vmem:[%s1533_s29 + $0x10] sm:$0xff]  ;;  %s963_s30 = sadd.s32 1, %s1537_s14  ;;  %s949_s27 = sadd.s32 1, %s1541_s27   ;;  %s1541_s27 = sphi %s1539_s27, %s949_s27   ;;  %s1537_s14 = sphi %s1723_s14, %s1768_s14   ;;  %s1533_s29 = sphi %s1767_s29, %s968_s29   ;;  %s1529_s24 = sphi %s1766_s24, %s969_s24  }
 0x43c   : >> { %956 = vst [vmem:[%s1529_s24] sm:$0xff] %v955_v44  ;;  %958 = vst [vmem:[%s1529_s24 + $0x8] sm:$0xff] %v957_v45  ;;  %v961_v47 = vld [vmem:[%s1533_s29 + $0x18] sm:$0xff]  ;;  %p964_p8 = scmp.ge.s32.totalorder %s963_s30, %s1714_s26  ;;  %p948_p9 = scmp.ge.s32.totalorder %s949_s27, %s1714_s26 }
 0x43d   : >> { %960 = vst [vmem:[%s1529_s24 + $0x10] sm:$0xff] %v959_v46  ;;  %962 = vst [vmem:[%s1529_s24 + $0x18] sm:$0xff] %v961_v47 }
 0x43e   : >> { %s1775_s30 = smov (%p964_p8, %s963_s30), 0  ;;  %951 = sbr.rel (!%p948_p9) target bundleno = 1083 (0x43b), region = 141 }
 0x43f   : >> { %s1165_s7 = sshll.u32 %s1775_s30, 5  ;;  %s1768_s14 = smov %s1775_s30 }
 0x440   : >> { %s968_s29 = scalar_lea.vmem %s1695_s16, %s1165_s7 [#allocation4]   ;;  %s969_s24 = scalar_lea.vmem %s1708_s20, %s1165_s7  }
 0x443 PF: > { %s1739_s8 = sand.u32 3, %s1773_s21   ;;  %s1176_s9 = sshll.u32 %s1714_s26, 5 }
 0x444   : > { %s974_s10 = scalar_lea.vmem %s1695_s16, %s1176_s9 [#allocation4]   ;;  %s976_s11 = scalar_lea.vmem %s1708_s20, %s1176_s9  }
 0x445   : > { %p1170_p10 = scmp.le.s32.totalorder %s1739_s8, 0 }
 0x446   : > { %s1543_s12 = smov (!%p1170_p10), %s976_s11   ;;  %s1547_s13 = smov (!%p1170_p10), %s974_s10  }
 0x447   : > { %1070 = sbr.rel (%p1170_p10) target bundleno = 1108 (0x454), region = 146  ;;  %s1551_s15 = smov (!%p1170_p10), 0  }
 0x448   : > { %s1555_s17 = smov (!%p1170_p10), 0  }
 0x44c LB: >> { %v986_v48 = vld [vmem:[%s1549_s13] sm:$0xff]  ;;  %s988_s21 = sadd.s32 1, %s1553_s15  ;;  %s980_s17 = sadd.s32 1, %s1557_s17   ;;  %s1557_s17 = sphi %s1555_s17, %s980_s17   ;;  %s1553_s15 = sphi %s1551_s15, %s1552_s15   ;;  %s1549_s13 = sphi %s1547_s13, %s993_s13   ;;  %s1545_s12 = sphi %s1543_s12, %s994_s12  }
 0x44d   : >> { %987 = vst [vmem:[%s1545_s12] sm:$0xff] %v986_v48  ;;  %p989_p11 = scmp.ge.s32.totalorder %s988_s21, %s1739_s8  ;;  %p979_p12 = scmp.ge.s32.totalorder %s980_s17, %s1739_s8 }
 0x44f   : >> { %s1777_s21 = smov (%p989_p11, %s988_s21), 0  ;;  %982 = sbr.rel (!%p979_p12) target bundleno = 1100 (0x44c), region = 152 }
 0x450   : >> { %s1171_s16 = sshll.u32 %s1777_s21, 3  ;;  %s1552_s15 = smov %s1777_s21  }
 0x451   : >> { %s993_s13 = scalar_lea.vmem %s974_s10, %s1171_s16 [#allocation4]   ;;  %s994_s12 = scalar_lea.vmem %s976_s11, %s1171_s16  }
 0x454 PF: > { %p14_p13 = scmp.ge.s32.totalorder %s1612_s25, 4   ;;  %s1769_s21 = smov %s1521_s22 }
 0x455   : > { %s1770_s22 = smov %s1620_s28  ;;  %s1771_s23 = smov %s1612_s25 }
 0x456   :  { %16 = sbr.rel (!%p14_p13) target bundleno = 2 (0x2), region = 163 }
 0x45b   :  { %1010 = vsyncpa [#allocation3], 1 }
 0x45c   :  { %1012 = vsyncpa [#allocation3 + $0x1], 1 }

</bundles_post_ra>
